<compile_context>
chip_gen: v7x
topology: tpu7x:2x2x1
jax: 0.10.0
libtpu: 0.0.40
codegen_flags: <defaults>
</compile_context>

<pallas_src>
import jax
import jax.numpy as jnp
from jax.experimental import pallas as pl
from jax.experimental.pallas import tpu as pltpu


def bpr_kernel(u_idx_ref, i_idx_ref, j_idx_ref,   # SMEM (Bp,) int32 (scalar prefetch)
               eu_hbm, ei_hbm,                    # HBM tables: (U, F), (I, F)
               out_ref,                           # VMEM (tile_b, 2) output block
               u_buf, vi_buf, vj_buf,             # VMEM (tile_b, F) gather scratch
               sem):                              # DMA semaphores (3,)
    tile_b = u_buf.shape[0]
    base = pl.program_id(0) * tile_b

    # Issue every row-gather DMA for this tile first (they run concurrently,
    # hiding per-row HBM latency), then wait for all of them.
    @pl.loop(0, tile_b)
    def _issue(r):
        pltpu.make_async_copy(
            eu_hbm.at[pl.ds(u_idx_ref[base + r], 1), :],
            u_buf.at[pl.ds(r, 1), :], sem.at[0]).start()
        pltpu.make_async_copy(
            ei_hbm.at[pl.ds(i_idx_ref[base + r], 1), :],
            vi_buf.at[pl.ds(r, 1), :], sem.at[1]).start()
        pltpu.make_async_copy(
            ei_hbm.at[pl.ds(j_idx_ref[base + r], 1), :],
            vj_buf.at[pl.ds(r, 1), :], sem.at[2]).start()

    @pl.loop(0, tile_b)
    def _wait(r):
        # One row-sized wait per issued copy; descriptors only need shape + sem.
        pltpu.make_async_copy(eu_hbm.at[pl.ds(0, 1), :],
                              u_buf.at[pl.ds(0, 1), :], sem.at[0]).wait()
        pltpu.make_async_copy(ei_hbm.at[pl.ds(0, 1), :],
                              vi_buf.at[pl.ds(0, 1), :], sem.at[1]).wait()
        pltpu.make_async_copy(ei_hbm.at[pl.ds(0, 1), :],
                              vj_buf.at[pl.ds(0, 1), :], sem.at[2]).wait()

    # Elementwise multiply + factor-dim reduction, accumulated in f32.
    u = u_buf[...].astype(jnp.float32)
    vi = vi_buf[...].astype(jnp.float32)
    vj = vj_buf[...].astype(jnp.float32)
    out_ref[:, 0:1] = jnp.sum(u * vi, axis=-1, keepdims=True).astype(out_ref.dtype)
    out_ref[:, 1:2] = jnp.sum(u * vj, axis=-1, keepdims=True).astype(out_ref.dtype)


def _round_up(x, m):
    return (x + m - 1) // m * m


def _choose_tile_b(batch, factor, itemsize, requested):
    """Batch tile: multiple of 8, VMEM-bounded, and >=2 grid steps when possible."""
    b8 = _round_up(max(batch, 1), 8)
    tile = max(8, min(_round_up(requested, 8), b8))
    # Gather scratch is 3 * tile * F * itemsize (not double-buffered).  Keep it
    # well under the default scoped-VMEM limit on every generation (v5e 16 MiB
    # default, v7x 64 MiB physical).
    vmem_budget = 8 * 1024 * 1024
    cap = max(8, (vmem_budget // (3 * factor * itemsize)) // 8 * 8)
    tile = min(tile, cap)
    # Keep at least two grid steps when the batch allows it so v7x's two
    # TensorCores both get work under dimension_semantics=("parallel",).
    if tile >= b8 and b8 >= 16:
        tile = max(8, (b8 // 2) // 8 * 8)
    return tile


def bpr_forward(embed_user, embed_item, user, item_i, item_j, *, tile_b=256):
    """Fused BPR forward.

    Returns (pred_i, pred_j) with
      pred_x[b] = <embed_user[user[b]], embed_item[item_x[b]]>.
    """
    B = int(user.shape[0])
    F = int(embed_user.shape[1])
    dtype = embed_user.dtype
    itemsize = jnp.dtype(dtype).itemsize

    tile_b = _choose_tile_b(B, F, itemsize, tile_b)
    Bp = _round_up(B, tile_b)

    u_idx = user.astype(jnp.int32)
    i_idx = item_i.astype(jnp.int32)
    j_idx = item_j.astype(jnp.int32)
    if Bp != B:
        pad = Bp - B
        # Pad with index 0 (always a valid row); padded outputs are sliced off.
        u_idx = jnp.pad(u_idx, (0, pad))
        i_idx = jnp.pad(i_idx, (0, pad))
        j_idx = jnp.pad(j_idx, (0, pad))

    out = pl.pallas_call(
        bpr_kernel,
        out_shape=jax.ShapeDtypeStruct((Bp, 2), dtype),
        grid_spec=pltpu.PrefetchScalarGridSpec(
            num_scalar_prefetch=3,
            grid=(Bp // tile_b,),
            in_specs=[
                pl.BlockSpec(memory_space=pl.ANY),   # embed_user table (HBM)
                pl.BlockSpec(memory_space=pl.ANY),   # embed_item table (HBM)
            ],
            out_specs=pl.BlockSpec((tile_b, 2), lambda b, *_: (b, 0)),
            scratch_shapes=[
                pltpu.VMEM((tile_b, F), dtype),      # gathered user rows
                pltpu.VMEM((tile_b, F), dtype),      # gathered item_i rows
                pltpu.VMEM((tile_b, F), dtype),      # gathered item_j rows
                pltpu.SemaphoreType.DMA((3,)),
            ],
        ),
        compiler_params=pltpu.CompilerParams(
            dimension_semantics=("parallel",),
        ),
    )(u_idx, i_idx, j_idx, embed_user, embed_item)

    return out[:B, 0], out[:B, 1]


if __name__ == "__main__":
    user_num, item_num, factor_num = 16, 32, 32
    batch = 20  # deliberately ragged: exercises padding + a multi-step grid

    key = jax.random.PRNGKey(0)
    k_u, k_i, k_idx_u, k_idx_i, k_idx_j = jax.random.split(key, 5)

    # nn.init.normal_(..., std=0.01) equivalents
    embed_user = 0.01 * jax.random.normal(k_u, (user_num, factor_num), jnp.float32)
    embed_item = 0.01 * jax.random.normal(k_i, (item_num, factor_num), jnp.float32)

    user = jax.random.randint(k_idx_u, (batch,), 0, user_num, jnp.int32)
    item_i = jax.random.randint(k_idx_i, (batch,), 0, item_num, jnp.int32)
    item_j = jax.random.randint(k_idx_j, (batch,), 0, item_num, jnp.int32)

    pred_i, pred_j = bpr_forward(embed_user, embed_item, user, item_i, item_j)
    jax.block_until_ready((pred_i, pred_j))

    # Reference check (pure JAX)
    u_ref = embed_user[user]
    ref_i = jnp.sum(u_ref * embed_item[item_i], axis=-1)
    ref_j = jnp.sum(u_ref * embed_item[item_j], axis=-1)
    assert pred_i.shape == (batch,) and pred_j.shape == (batch,)
    assert jnp.allclose(pred_i, ref_i, atol=1e-6, rtol=1e-6)
    assert jnp.allclose(pred_j, ref_j, atol=1e-6, rtol=1e-6)

    print("KERNEL_OK")
</pallas_src>

<mosaic_0001>
module attributes {stable_mosaic.version = 11 : i64} {
  func.func @bpr_kernel(%arg0: i32, %arg1: memref<24xi32, #tpu.memory_space<smem>>, %arg2: memref<24xi32, #tpu.memory_space<smem>>, %arg3: memref<24xi32, #tpu.memory_space<smem>>, %arg4: memref<16x32xf32, #tpu.memory_space<any>>, %arg5: memref<32x32xf32, #tpu.memory_space<any>>, %arg6: memref<8x2xf32, #tpu.memory_space<vmem>>, %arg7: memref<8x32xf32, #tpu.memory_space<vmem>>, %arg8: memref<8x32xf32, #tpu.memory_space<vmem>>, %arg9: memref<8x32xf32, #tpu.memory_space<vmem>>, %arg10: memref<3x!tpu.dma_semaphore, #tpu.memory_space<semaphore_mem>>) attributes {dimension_semantics = [#tpu.dimension_semantics<parallel>], iteration_bounds = array<i64: 3>, scalar_prefetch = 3 : i64, scratch_operands = 4 : i64, tpu.core_type = #tpu.core_type<tc>, window_params = [{}, {}, {transform_indices = @transform_2, window_bounds = array<i64: 8, 2>}]} {
    %c8_i32 = arith.constant 8 : i32
    %0 = arith.muli %arg0, %c8_i32 : i32
    %c0_i32 = arith.constant 0 : i32
    %c8_i32_0 = arith.constant 8 : i32
    %1 = arith.addi %c0_i32, %c8_i32_0 : i32
    %c1_i32 = arith.constant 1 : i32
    scf.for %arg11 = %c0_i32 to %1 step %c1_i32  : i32 {
      %c1_i32_14 = arith.constant 1 : i32
      %14 = arith.muli %arg11, %c1_i32_14 : i32
      %c0_i32_15 = arith.constant 0 : i32
      %15 = arith.addi %c0_i32_15, %14 : i32
      %16 = arith.addi %0, %15 : i32
      %17 = arith.index_cast %16 : i32 to index
      %18 = memref.load %arg1[%17] : memref<24xi32, #tpu.memory_space<smem>>
      %c0_i32_16 = arith.constant 0 : i32
      %c0_i32_17 = arith.constant 0 : i32
      %19 = tpu.memref_slice %arg4[%18, %c0_i32_17] : memref<16x32xf32, #tpu.memory_space<any>> -> memref<1x32xf32, #tpu.memory_space<any>>
      %c0_i32_18 = arith.constant 0 : i32
      %20 = tpu.memref_slice %arg7[%15, %c0_i32_18] : memref<8x32xf32, #tpu.memory_space<vmem>> -> memref<1x32xf32, #tpu.memory_space<vmem>>
      %21 = tpu.memref_slice %arg10[%c0_i32_16] : memref<3x!tpu.dma_semaphore, #tpu.memory_space<semaphore_mem>> -> memref<1x!tpu.dma_semaphore, #tpu.memory_space<semaphore_mem>>
      %22 = tpu.memref_squeeze %21 : memref<1x!tpu.dma_semaphore, #tpu.memory_space<semaphore_mem>> -> memref<!tpu.dma_semaphore, #tpu.memory_space<semaphore_mem>>
      tpu.enqueue_dma source(%19 : memref<1x32xf32, #tpu.memory_space<any>>) target(%20 : memref<1x32xf32, #tpu.memory_space<vmem>>) target_semaphore(%22 : memref<!tpu.dma_semaphore, #tpu.memory_space<semaphore_mem>>)
      %23 = arith.addi %0, %15 : i32
      %24 = arith.index_cast %23 : i32 to index
      %25 = memref.load %arg2[%24] : memref<24xi32, #tpu.memory_space<smem>>
      %c1_i32_19 = arith.constant 1 : i32
      %c0_i32_20 = arith.constant 0 : i32
      %26 = tpu.memref_slice %arg5[%25, %c0_i32_20] : memref<32x32xf32, #tpu.memory_space<any>> -> memref<1x32xf32, #tpu.memory_space<any>>
      %c0_i32_21 = arith.constant 0 : i32
      %27 = tpu.memref_slice %arg8[%15, %c0_i32_21] : memref<8x32xf32, #tpu.memory_space<vmem>> -> memref<1x32xf32, #tpu.memory_space<vmem>>
      %28 = tpu.memref_slice %arg10[%c1_i32_19] : memref<3x!tpu.dma_semaphore, #tpu.memory_space<semaphore_mem>> -> memref<1x!tpu.dma_semaphore, #tpu.memory_space<semaphore_mem>>
      %29 = tpu.memref_squeeze %28 : memref<1x!tpu.dma_semaphore, #tpu.memory_space<semaphore_mem>> -> memref<!tpu.dma_semaphore, #tpu.memory_space<semaphore_mem>>
      tpu.enqueue_dma source(%26 : memref<1x32xf32, #tpu.memory_space<any>>) target(%27 : memref<1x32xf32, #tpu.memory_space<vmem>>) target_semaphore(%29 : memref<!tpu.dma_semaphore, #tpu.memory_space<semaphore_mem>>)
      %30 = arith.addi %0, %15 : i32
      %31 = arith.index_cast %30 : i32 to index
      %32 = memref.load %arg3[%31] : memref<24xi32, #tpu.memory_space<smem>>
      %c2_i32 = arith.constant 2 : i32
      %c0_i32_22 = arith.constant 0 : i32
      %33 = tpu.memref_slice %arg5[%32, %c0_i32_22] : memref<32x32xf32, #tpu.memory_space<any>> -> memref<1x32xf32, #tpu.memory_space<any>>
      %c0_i32_23 = arith.constant 0 : i32
      %34 = tpu.memref_slice %arg9[%15, %c0_i32_23] : memref<8x32xf32, #tpu.memory_space<vmem>> -> memref<1x32xf32, #tpu.memory_space<vmem>>
      %35 = tpu.memref_slice %arg10[%c2_i32] : memref<3x!tpu.dma_semaphore, #tpu.memory_space<semaphore_mem>> -> memref<1x!tpu.dma_semaphore, #tpu.memory_space<semaphore_mem>>
      %36 = tpu.memref_squeeze %35 : memref<1x!tpu.dma_semaphore, #tpu.memory_space<semaphore_mem>> -> memref<!tpu.dma_semaphore, #tpu.memory_space<semaphore_mem>>
      tpu.enqueue_dma source(%33 : memref<1x32xf32, #tpu.memory_space<any>>) target(%34 : memref<1x32xf32, #tpu.memory_space<vmem>>) target_semaphore(%36 : memref<!tpu.dma_semaphore, #tpu.memory_space<semaphore_mem>>)
    }
    %c8_i32_1 = arith.constant 8 : i32
    %c0_i32_2 = arith.constant 0 : i32
    %c8_i32_3 = arith.constant 8 : i32
    %2 = arith.addi %c0_i32_2, %c8_i32_3 : i32
    %c1_i32_4 = arith.constant 1 : i32
    scf.for %arg11 = %c0_i32_2 to %2 step %c1_i32_4  : i32 {
      %c0_i32_14 = arith.constant 0 : i32
      %c0_i32_15 = arith.constant 0 : i32
      %c0_i32_16 = arith.constant 0 : i32
      %14 = tpu.memref_slice %arg4[%c0_i32_15, %c0_i32_16] : memref<16x32xf32, #tpu.memory_space<any>> -> memref<1x32xf32, #tpu.memory_space<any>>
      %c0_i32_17 = arith.constant 0 : i32
      %c0_i32_18 = arith.constant 0 : i32
      %15 = tpu.memref_slice %arg7[%c0_i32_17, %c0_i32_18] : memref<8x32xf32, #tpu.memory_space<vmem>> -> memref<1x32xf32, #tpu.memory_space<vmem>>
      %16 = tpu.memref_slice %arg10[%c0_i32_14] : memref<3x!tpu.dma_semaphore, #tpu.memory_space<semaphore_mem>> -> memref<1x!tpu.dma_semaphore, #tpu.memory_space<semaphore_mem>>
      %17 = tpu.memref_squeeze %16 : memref<1x!tpu.dma_semaphore, #tpu.memory_space<semaphore_mem>> -> memref<!tpu.dma_semaphore, #tpu.memory_space<semaphore_mem>>
      tpu.wait_dma2 semaphore(%17 : memref<!tpu.dma_semaphore, #tpu.memory_space<semaphore_mem>>) src(%14 : memref<1x32xf32, #tpu.memory_space<any>>) dst(%15 : memref<1x32xf32, #tpu.memory_space<vmem>>)
      %c1_i32_19 = arith.constant 1 : i32
      %c0_i32_20 = arith.constant 0 : i32
      %c0_i32_21 = arith.constant 0 : i32
      %18 = tpu.memref_slice %arg5[%c0_i32_20, %c0_i32_21] : memref<32x32xf32, #tpu.memory_space<any>> -> memref<1x32xf32, #tpu.memory_space<any>>
      %c0_i32_22 = arith.constant 0 : i32
      %c0_i32_23 = arith.constant 0 : i32
      %19 = tpu.memref_slice %arg8[%c0_i32_22, %c0_i32_23] : memref<8x32xf32, #tpu.memory_space<vmem>> -> memref<1x32xf32, #tpu.memory_space<vmem>>
      %20 = tpu.memref_slice %arg10[%c1_i32_19] : memref<3x!tpu.dma_semaphore, #tpu.memory_space<semaphore_mem>> -> memref<1x!tpu.dma_semaphore, #tpu.memory_space<semaphore_mem>>
      %21 = tpu.memref_squeeze %20 : memref<1x!tpu.dma_semaphore, #tpu.memory_space<semaphore_mem>> -> memref<!tpu.dma_semaphore, #tpu.memory_space<semaphore_mem>>
      tpu.wait_dma2 semaphore(%21 : memref<!tpu.dma_semaphore, #tpu.memory_space<semaphore_mem>>) src(%18 : memref<1x32xf32, #tpu.memory_space<any>>) dst(%19 : memref<1x32xf32, #tpu.memory_space<vmem>>)
      %c2_i32 = arith.constant 2 : i32
      %c0_i32_24 = arith.constant 0 : i32
      %c0_i32_25 = arith.constant 0 : i32
      %22 = tpu.memref_slice %arg5[%c0_i32_24, %c0_i32_25] : memref<32x32xf32, #tpu.memory_space<any>> -> memref<1x32xf32, #tpu.memory_space<any>>
      %c0_i32_26 = arith.constant 0 : i32
      %c0_i32_27 = arith.constant 0 : i32
      %23 = tpu.memref_slice %arg9[%c0_i32_26, %c0_i32_27] : memref<8x32xf32, #tpu.memory_space<vmem>> -> memref<1x32xf32, #tpu.memory_space<vmem>>
      %24 = tpu.memref_slice %arg10[%c2_i32] : memref<3x!tpu.dma_semaphore, #tpu.memory_space<semaphore_mem>> -> memref<1x!tpu.dma_semaphore, #tpu.memory_space<semaphore_mem>>
      %25 = tpu.memref_squeeze %24 : memref<1x!tpu.dma_semaphore, #tpu.memory_space<semaphore_mem>> -> memref<!tpu.dma_semaphore, #tpu.memory_space<semaphore_mem>>
      tpu.wait_dma2 semaphore(%25 : memref<!tpu.dma_semaphore, #tpu.memory_space<semaphore_mem>>) src(%22 : memref<1x32xf32, #tpu.memory_space<any>>) dst(%23 : memref<1x32xf32, #tpu.memory_space<vmem>>)
    }
    %c0 = arith.constant 0 : index
    %c0_5 = arith.constant 0 : index
    %3 = vector.load %arg7[%c0, %c0_5] : memref<8x32xf32, #tpu.memory_space<vmem>>, vector<8x32xf32>
    %c0_6 = arith.constant 0 : index
    %c0_7 = arith.constant 0 : index
    %4 = vector.load %arg8[%c0_6, %c0_7] : memref<8x32xf32, #tpu.memory_space<vmem>>, vector<8x32xf32>
    %c0_8 = arith.constant 0 : index
    %c0_9 = arith.constant 0 : index
    %5 = vector.load %arg9[%c0_8, %c0_9] : memref<8x32xf32, #tpu.memory_space<vmem>>, vector<8x32xf32>
    %6 = arith.mulf %3, %4 : vector<8x32xf32>
    %cst = arith.constant dense<0.000000e+00> : vector<8xf32>
    %7 = vector.multi_reduction <add>, %6, %cst [1] : vector<8x32xf32> to vector<8xf32>
    %8 = vector.shape_cast %7 : vector<8xf32> to vector<8x1xf32>
    %c0_10 = arith.constant 0 : index
    %c0_11 = arith.constant 0 : index
    %9 = vector.load %arg6[%c0_10, %c0_11] : memref<8x2xf32, #tpu.memory_space<vmem>>, vector<8x1xf32>
    tpu.vector_store %arg6[%c0_10, %c0_11], %8 {strides = array<i32>} : memref<8x2xf32, #tpu.memory_space<vmem>>, vector<8x1xf32>,
    %10 = arith.mulf %3, %5 : vector<8x32xf32>
    %cst_12 = arith.constant dense<0.000000e+00> : vector<8xf32>
    %11 = vector.multi_reduction <add>, %10, %cst_12 [1] : vector<8x32xf32> to vector<8xf32>
    %12 = vector.shape_cast %11 : vector<8xf32> to vector<8x1xf32>
    %c0_13 = arith.constant 0 : index
    %c1 = arith.constant 1 : index
    %13 = vector.load %arg6[%c0_13, %c1] : memref<8x2xf32, #tpu.memory_space<vmem>>, vector<8x1xf32>
    tpu.vector_store %arg6[%c0_13, %c1], %12 {strides = array<i32>} : memref<8x2xf32, #tpu.memory_space<vmem>>, vector<8x1xf32>,
    return
  }
  func.func @transform_2(%arg0: i32, %arg1: memref<24xi32, #tpu.memory_space<smem>>, %arg2: memref<24xi32, #tpu.memory_space<smem>>, %arg3: memref<24xi32, #tpu.memory_space<smem>>) -> (i32, i32) {
    %c0_i32 = arith.constant 0 : i32
    %c0_i32_0 = arith.constant 0 : i32
    return %arg0, %c0_i32 : i32, i32
  }
}

</mosaic_0001>

<bundles_post_ra>
// kernel: tpu_custom_call.1
= control target key start
LH: loop header
LB: loop body
LE: loop exit
PB: predicated region body
PF: predicated region fallthrough
CT: control target
= control target key end

     0   :  { %s532_s0 = inlined_call_operand.hbm [shape: s32[24], index: 0, kind: input, shape index: {}]   ;;  %s533_s3 = inlined_call_operand.hbm [shape: f32[16,32], index: 3, kind: input, shape index: {}]   ;;  %s534_s4 = inlined_call_operand.hbm [shape: f32[32,32], index: 4, kind: input, shape index: {}]   ;;  %s535_s5 = inlined_call_operand.vmem [shape: f32[24,2], index: 5, kind: output, shape index: {}]   ;;  %s536_s1 = inlined_call_operand.vmem [shape: s32[24], index: 1, kind: input, shape index: {}]   ;;  %s537_s2 = inlined_call_operand.vmem [shape: s32[24], index: 2, kind: input, shape index: {}]  }
   0x1   :  { %s265_s20 = scalar_lea.hbm %s532_s0, 16 }
   0x2   :  { %p266_p0 = scmp.ne.s32.totalorder %s532_s0, %s265_s20  ;;  %p269_p1 = scmp.lt.u32.totalorder %s265_s20, %s532_s0 }
   0x4   :  { %p271_p2 = pnand %p269_p1, %p266_p0 }
   0x6   :  { %274 = shalt.err (!%p271_p2)  }
   0x7   :  { %s403_s25 = smov [#allocation7]   ;;  %s12_s30 = sshll.u32 %s536_s1, 4  ;;  %s13_s30 = int_to_ptr.vmem [resolvable:$true] %s12_s30 }
   0x8   :  { %11 = dma.hbm_to_smem %s532_s0, 16, %s403_s25, [#allocation6] }
   0x9   :  { %s16_s8 = sshll.u32 %s537_s2, 4  ;;  %s275_s9 = scalar_lea.vmem %s13_s30, 16  ;;  %s17_s8 = int_to_ptr.vmem [resolvable:$true] %s16_s8 }
   0xa   :  { %p276_p3 = scmp.ne.s32.totalorder %s13_s30, %s275_s9  ;;  %p280_p4 = scmp.lt.s32.totalorder %s13_s30, %s13_s30 }
   0xb   :  { %p281_p5 = scmp.lt.s32.totalorder %s275_s9, %s275_s9 }
   0xd   :  { %p282_p6 = por %p281_p5, %p280_p4 }
   0xf   :  { %p283_p7 = pnand %p282_p6, %p276_p3 }
  0x11   :  { %286 = shalt.err (!%p283_p7)  }
  0x12   :  { %s404_s10 = smov [#allocation8]   ;;  %s287_s0 = scalar_lea.vmem %s17_s8, 16 }
  0x13   :  { %15 = dma.vmem_to_smem %s13_s30, 16, %s404_s10, [#allocation6] }
  0x14   :  { %p288_p8 = scmp.ne.s32.totalorder %s17_s8, %s287_s0  ;;  %p292_p9 = scmp.lt.s32.totalorder %s17_s8, %s17_s8 }
  0x15   :  { %p293_p10 = scmp.lt.s32.totalorder %s287_s0, %s287_s0 }
  0x17   :  { %p294_p11 = por %p293_p10, %p292_p9 }
  0x19   :  { %p295_p12 = pnand %p294_p11, %p288_p8 }
  0x1b   :  { %298 = shalt.err (!%p295_p12)  }
  0x1c   :  { %s405_s1 = smov [#allocation9]  }
  0x1d   :  { %19 = dma.vmem_to_smem %s17_s8, 16, %s405_s1, [#allocation6] }
  0x1e   :  { %383 = dma.done.wait [#allocation6], 48 }
  0x1f   :  { %384 = vsyncadd [#allocation6], 4294967248 }
  0x20   :  { %21 = sfence }
  0x21   :  { %s457_s2 = smov 0  }
  0x22 LB: > { %p227_p13 = scmp.ge.s32.totalorder %s393_s2, 3  ;;  %s393_s2 = sphi %s457_s2, %s27_s2  }
  0x23   : > { %p59_p0 = scmp.lt.s32.totalorder (!%p227_p13), %s393_s2, 2  ;;  %s229_s11 = sshll.u32 (!%p227_p13), %s393_s2, 3 }
  0x24   : > { %52 = sbr.rel (%p227_p13) target bundleno = 290 (0x122), region = 12  ;;  %s471_s17 = smov (!%p227_p13), 0  }
  0x2b   : > { %s60_s12 = scalar_select %p59_p0, %s393_s2, 2 }
  0x2d   : > { %s228_s13 = sshll.u32 %s60_s12, 3 }
  0x2e   : > { %s469_s16 = scalar_lea.vmem %s535_s5, %s228_s13 }
  0x2f LB: >> { %s70_s18 = sadd.s32 %s397_s17, %s229_s11  ;;  %s74_s20 = scalar_lea.vmem [#allocation2], %s397_s17  ;;  %s397_s17 = sphi %s471_s17, %s69_s17  }
  0x30   : >> { %s71_s19 = sld [smem:[#allocation7 + %s70_s18]]  ;;  %s82_s21 = sshll.u32 %s74_s20, 4  ;;  %s83_s21 = int_to_ptr.vmem [resolvable:$true] %s82_s21 }
  0x31   : >> { %s480_s22 = sld [smem:[#allocation8 + %s70_s18]]  ;;  %s89_s24 = scalar_lea.vmem [#allocation3], %s397_s17 }
  0x32   : >> { %s482_s23 = sld [smem:[#allocation9 + %s70_s18]]  ;;  %s98_s25 = sshll.u32 %s89_s24, 4  ;;  %s486_s25 = int_to_ptr.vmem [resolvable:$true] %s98_s25 }
  0x33   : >> { %s105_s26 = scalar_lea.vmem [#allocation4], %s397_s17  ;;  %s301_s0 = scalar_lea.hbm %s533_s3, 256 }
  0x34   : >> { %s114_s27 = sshll.u32 %s105_s26, 4  ;;  %s488_s27 = int_to_ptr.vmem [resolvable:$true] %s114_s27 }
  0x36   : >> { %s230_s28 = sshll.u32 %s71_s19, 4 }
  0x37   : >> { %s73_s6 = scalar_lea.hbm %s533_s3, %s230_s28  ;;  %s231_s7 = sshll.u32 %s480_s22, 4 }
  0x38   : >> { %s299_s8 = scalar_lea.hbm %s73_s6, 16  ;;  %p302_p2 = scmp.lt.u32.totalorder %s73_s6, %s533_s3 }
  0x39   : >> { %p300_p1 = scmp.ne.s32.totalorder %s73_s6, %s299_s8  ;;  %p303_p3 = scmp.lt.u32.totalorder %s301_s0, %s299_s8 }
  0x3a   : >> { %p305_p5 = scmp.lt.u32.totalorder %s299_s8, %s73_s6 }
  0x3b   : >> { %p304_p4 = por %p303_p3, %p302_p2 }
  0x3d   : >> { %p306_p6 = por %p305_p5, %p304_p4 }
  0x3f   : >> { %p307_p7 = pnand %p306_p6, %p300_p1 }
  0x41   : >> { %310 = shalt.err (!%p307_p7)  }
  0x42   : >> { %s311_s13 = scalar_lea.vmem %s83_s21, 16  ;;  %s406_s14 = smov [#allocation2]  }
  0x43   : >> { %p312_p8 = scmp.ne.s32.totalorder %s83_s21, %s311_s13  ;;  %s313_s15 = sshll.u32 %s406_s14, 4  ;;  %s314_s15 = int_to_ptr.vmem [resolvable:$false] %s313_s15 }
  0x44   : >> { %s315_s18 = scalar_lea.vmem %s314_s15, 128  ;;  %p316_p9 = scmp.lt.s32.totalorder %s83_s21, %s314_s15 }
  0x45   : >> { %p317_p10 = scmp.lt.s32.totalorder %s315_s18, %s311_s13 }
  0x47   : >> { %p318_p11 = por %p317_p10, %p316_p9 }
  0x49   : >> { %p319_p12 = pnand %p318_p11, %p312_p8 }
  0x4b   : >> { %322 = shalt.err (!%p319_p12)  }
  0x4c   : >> { %85 = dma.hbm_to_vmem [thread:$0]  %s73_s6, 16, %s83_s21, [#allocation5] }
  0x4d   : >> { %s88_s22 = scalar_lea.hbm %s534_s4, %s231_s7  ;;  %s232_s24 = sshll.u32 %s482_s23, 4 }
  0x4e   : >> { %s323_s26 = scalar_lea.hbm %s88_s22, 16  ;;  %s325_s30 = scalar_lea.hbm %s534_s4, 512 }
  0x4f   : >> { %p324_p13 = scmp.ne.s32.totalorder %s88_s22, %s323_s26  ;;  %p326_p0 = scmp.lt.u32.totalorder %s88_s22, %s534_s4 }
  0x50   : >> { %p327_p1 = scmp.lt.u32.totalorder %s325_s30, %s323_s26  ;;  %p329_p3 = scmp.lt.u32.totalorder %s323_s26, %s88_s22 }
  0x52   : >> { %p328_p2 = por %p327_p1, %p326_p0 }
  0x54   : >> { %p330_p4 = por %p329_p3, %p328_p2 }
  0x56   : >> { %p331_p5 = pnand %p330_p4, %p324_p13 }
  0x58   : >> { %334 = shalt.err (!%p331_p5)  }
  0x59   : >> { %s335_s21 = scalar_lea.vmem %s486_s25, 16  ;;  %s407_s23 = smov [#allocation3]  }
  0x5a   : >> { %p336_p6 = scmp.ne.s32.totalorder %s486_s25, %s335_s21  ;;  %s337_s6 = sshll.u32 %s407_s23, 4  ;;  %s338_s6 = int_to_ptr.vmem [resolvable:$false] %s337_s6 }
  0x5b   : >> { %s339_s7 = scalar_lea.vmem %s338_s6, 128  ;;  %p340_p7 = scmp.lt.s32.totalorder %s486_s25, %s338_s6 }
  0x5c   : >> { %p341_p8 = scmp.lt.s32.totalorder %s339_s7, %s335_s21 }
  0x5e   : >> { %p342_p9 = por %p341_p8, %p340_p7 }
  0x60   : >> { %p343_p10 = pnand %p342_p9, %p336_p6 }
  0x62   : >> { %346 = shalt.err (!%p343_p10)  }
  0x63   : >> { %101 = dma.hbm_to_vmem [thread:$0]  %s88_s22, 16, %s486_s25, [#allocation5 + $0x1] }
  0x64   : >> { %s104_s1 = scalar_lea.hbm %s534_s4, %s232_s24 }
  0x65   : >> { %s347_s12 = scalar_lea.hbm %s104_s1, 16  ;;  %p350_p12 = scmp.lt.u32.totalorder %s104_s1, %s534_s4 }
  0x66   : >> { %p348_p11 = scmp.ne.s32.totalorder %s104_s1, %s347_s12  ;;  %p351_p13 = scmp.lt.u32.totalorder %s325_s30, %s347_s12 }
  0x67   : >> { %p353_p1 = scmp.lt.u32.totalorder %s347_s12, %s104_s1 }
  0x68   : >> { %p352_p0 = por %p351_p13, %p350_p12 }
  0x6a   : >> { %p354_p2 = por %p353_p1, %p352_p0 }
  0x6c   : >> { %p355_p3 = pnand %p354_p2, %p348_p11 }
  0x6e   : >> { %358 = shalt.err (!%p355_p3)  }
  0x6f   : >> { %s359_s25 = scalar_lea.vmem %s488_s27, 16  ;;  %s408_s15 = smov [#allocation4]  }
  0x70   : >> { %p360_p4 = scmp.ne.s32.totalorder %s488_s27, %s359_s25  ;;  %s361_s18 = sshll.u32 %s408_s15, 4  ;;  %s362_s18 = int_to_ptr.vmem [resolvable:$false] %s361_s18 }
  0x71   : >> { %s363_s19 = scalar_lea.vmem %s362_s18, 128  ;;  %p364_p5 = scmp.lt.s32.totalorder %s488_s27, %s362_s18 }
  0x72   : >> { %p365_p6 = scmp.lt.s32.totalorder %s363_s19, %s359_s25 }
  0x74   : >> { %p366_p7 = por %p365_p6, %p364_p5 }
  0x76   : >> { %p367_p8 = pnand %p366_p7, %p360_p4 }
  0x78   : >> { %370 = shalt.err (!%p367_p8)  }
  0x79   : >> { %117 = dma.hbm_to_vmem [thread:$0]  %s104_s1, 16, %s488_s27, [#allocation5 + $0x2] }
  0x7a   : >> { %s69_s17 = sadd.s32 1, %s397_s17  }
  0x7b   : >> { %p66_p9 = scmp.ge.s32.totalorder %s69_s17, 8  }
  0x7c   : > { %s399_s20 = smov (%p66_p9), 0  }
  0x7d   : > { %68 = sbr.rel (!%p66_p9) target bundleno = 47 (0x2f), region = 77 }
  0x84 LB: >> { %385 = dma.done.wait [#allocation5], 16  ;;  %s401_s20 = sphi %s399_s20, %s123_s20  }
  0x85   : >> { %386 = vsyncadd [#allocation5], 4294967280 }
  0x86   : >> { %387 = dma.done.wait [#allocation5 + $0x1], 16 }
  0x87   : >> { %388 = vsyncadd [#allocation5 + $0x1], 4294967280 }
  0x88   : >> { %389 = dma.done.wait [#allocation5 + $0x2], 16 }
  0x89   : >> { %390 = vsyncadd [#allocation5 + $0x2], 4294967280  ;;  %s123_s20 = sadd.s32 1, %s401_s20  }
  0x8a   : >> { %p120_p10 = scmp.ge.s32.totalorder %s123_s20, 8  }
  0x8b   : > { %v133_v0 = vld [vmem:[#allocation2] sm:$0xff] (%p120_p10)  ;;  %v134_v1 = vld [vmem:[#allocation3] sm:$0xff] (%p120_p10)  ;;  %vm137_vm0 = vcmask (%p120_p10), 261120   ;;  %v135_v2 = vld [vmem:[#allocation4] sm:$0xff] (%p120_p10)  ;;  %vm141_vm1 = vcmask (%p120_p10), 7168   ;;  %vm147_vm2 = vcmask (%p120_p10), 15368  }
  0x8c   : > { %122 = sbr.rel (!%p120_p10) target bundleno = 132 (0x84), region = 88  ;;  %v136_v3 = vmul.f32 (%p120_p10), %v134_v1, %v133_v0  ;;  %v143_v4 = vmul.f32 (%p120_p10), %v135_v2, %v133_v0 }
  0x8e   : > { %v138_v5 = vsel (%p120_p10), %vm137_vm0, %v136_v3, 0.0  ;;  %v144_v6 = vsel (%p120_p10), %vm137_vm0, %v143_v4, 0.0 }
  0x8f   : > { %139 = vadd.xlane.f32.xlu0 (%p120_p10), %v138_v5 }
  0x93   : > { %145 = vadd.xlane.f32.xlu0 %v144_v6 }
 0x11c   : > { %v140_v7 = vpop.xlane.xlu0 %139 }
 0x11d   : > { %142 = vst.msk [vmem:[%s469_s16] sm:$0xff] %vm141_vm1, %v140_v7 }
 0x120   : > { %v146_v8 = vpop.xlane.xlu0 %145 }
 0x121   : > { %148 = vst.msk [vmem:[%s469_s16] sm:$0xff] %vm147_vm2, %v146_v8 }
 0x122 PF: > { %s27_s2 = sadd.s32 1, %s393_s2  }
 0x123   : > { %p24_p11 = scmp.ge.s32.totalorder %s27_s2, 4  }
 0x125   :  { %26 = sbr.rel (!%p24_p11) target bundleno = 34 (0x22), region = 99 }
 0x12c   :  { %168 = vsyncmov [#allocation5] }
 0x12f   :  { %s169_s11 = vpop.sfrf %168 }
 0x130   :  { %p235_p12 = scmp.ne.s32.totalorder %s169_s11, 0 }
 0x132   :  { %173 = shalt.err (%p235_p12)  }
 0x133   :  { %175 = vsyncmov [#allocation5 + $0x1] }
 0x136   :  { %s176_s17 = vpop.sfrf %175 }
 0x137   :  { %p236_p13 = scmp.ne.s32.totalorder %s176_s17, 0 }
 0x139   :  { %180 = shalt.err (%p236_p13)  }
 0x13a   :  { %182 = vsyncmov [#allocation5 + $0x2] }
 0x13d   :  { %s183_s27 = vpop.sfrf %182 }
 0x13e   :  { %p237_p0 = scmp.ne.s32.totalorder %s183_s27, 0 }
 0x140   :  { %187 = shalt.err (%p237_p0)  }

</bundles_post_ra>
